<compile_context>
chip_gen: v7x
topology: tpu7x:2x2x1
jax: 0.10.0
libtpu: 0.0.40
codegen_flags: <defaults>
</compile_context>

<pallas_src>
import jax
import jax.numpy as jnp
import numpy as np
from jax.experimental import pallas as pl
from jax.experimental.pallas import tpu as pltpu


def transpose_conv_block(x, weight, bias, stride):
    """Forward of TransposeConvBlock (PyTorch nn.ConvTranspose1d semantics).

    x:      (N, C_in, L_in)   -- NCL, like PyTorch
    weight: (C_in, C_out, K)  -- torch ConvTranspose1d weight layout
    bias:   (C_out,)
    """
    N, C_in, L_in = x.shape
    _, C_out, K = weight.shape
    # The original module only defines `output_padding` when stride > 1
    # (stride == 1 would raise UnboundLocalError in __init__), so require it.
    assert stride > 1, "TransposeConvBlock requires stride > 1"
    S = int(stride)
    output_padding = S // 2
    padding = K // 2
    L_out = (L_in - 1) * S - 2 * padding + K + output_padding
    Lq = -(-L_out // S)                       # outputs per phase (ceil)

    # ---- static polyphase bookkeeping (pure Python, trace time) -------------
    # Output position l = q*S + r gets contributions from taps k with
    # (r + padding - k) % S == 0, at input index i = q + d, d = (r+padding-k)//S.
    phase_taps = []            # per phase r: list of (shift d, tap k)
    all_shifts = set()
    for r in range(S):
        taps = []
        for k in range(K):
            if (r + padding - k) % S == 0:
                d = (r + padding - k) // S
                taps.append((d, k))
                all_shifts.add(d)
        phase_taps.append(taps)
    shifts = sorted(all_shifts)
    d_min, d_max = shifts[0], shifts[-1]
    shift_idx = {d: h for h, d in enumerate(shifts)}

    # Pad shift slots so the matmul contraction dim is a multiple of 8 sublanes.
    D = len(shifts)
    D_pad = D
    while (D_pad * C_in) % 8 != 0:
        D_pad += 1

    # Halo-pad x (original x, NOT zero-inserted) so every (q + d) read is valid.
    pad_left = max(0, -d_min)
    pad_right = max(0, (Lq - 1 + d_max) - (L_in - 1))
    L_pad_x = L_in + pad_left + pad_right
    offsets = [d + pad_left for d in shifts] + [pad_left] * (D_pad - D)

    # ---- small traced glue: halo pad, fused weight matrix, phase bias -------
    dtype = x.dtype
    x_pad = jnp.pad(x, ((0, 0), (0, 0), (pad_left, pad_right)))

    SC = S * C_out
    DC = D_pad * C_in
    W_all = jnp.zeros((SC, DC), dtype)
    for r in range(S):
        for d, k in phase_taps[r]:
            h = shift_idx[d]
            W_all = W_all.at[r * C_out:(r + 1) * C_out,
                             h * C_in:(h + 1) * C_in].set(
                                 weight[:, :, k].T.astype(dtype))
    bias_full = jnp.tile(bias.astype(dtype), S).reshape(SC, 1)

    def _kernel(x_ref, w_ref, b_ref, o_ref):
        # x_ref: (1, C_in, L_pad_x)   w_ref: (SC, DC)
        # b_ref: (SC, 1)              o_ref: (1, SC, Lq)
        xb = x_ref[0, :, :]                                   # (C_in, L_pad_x)
        # im2col along lanes: D_pad statically-shifted windows of the input.
        parts = [xb[:, off:off + Lq] for off in offsets]      # each (C_in, Lq)
        cols = parts[0] if len(parts) == 1 else jnp.concatenate(parts, axis=0)
        # one fused MXU matmul for all taps and all output phases
        acc = jnp.dot(w_ref[...], cols, preferred_element_type=jnp.float32)
        acc = acc + b_ref[...]                                # bias broadcast
        o_ref[0, :, :] = acc.astype(o_ref.dtype)

    out_pm = pl.pallas_call(
        _kernel,
        out_shape=jax.ShapeDtypeStruct((N, SC, Lq), dtype),
        grid=(N,),
        in_specs=[
            pl.BlockSpec((1, C_in, L_pad_x), lambda n: (n, 0, 0)),
            pl.BlockSpec((SC, DC), lambda n: (0, 0)),
            pl.BlockSpec((SC, 1), lambda n: (0, 0)),
        ],
        out_specs=pl.BlockSpec((1, SC, Lq), lambda n: (n, 0, 0)),
        compiler_params=pltpu.CompilerParams(
            dimension_semantics=("parallel",)),
    )(x_pad, W_all, bias_full)

    # Interleave phases: y[n, co, q*S + r] = out_pm[n, r*C_out + co, q].
    y = out_pm.reshape(N, S, C_out, Lq)
    y = jnp.transpose(y, (0, 2, 3, 1)).reshape(N, C_out, Lq * S)
    return y[:, :, :L_out]


def _reference(x, weight, bias, stride):
    # Direct definition of ConvTranspose1d (scatter form), for verification.
    x = np.asarray(x); w = np.asarray(weight); b = np.asarray(bias)
    N, C_in, L_in = x.shape
    _, C_out, K = w.shape
    output_padding = stride // 2
    padding = K // 2
    L_out = (L_in - 1) * stride - 2 * padding + K + output_padding
    y = np.zeros((N, C_out, L_out), np.float32)
    for n in range(N):
        for ci in range(C_in):
            for i in range(L_in):
                for k in range(K):
                    l = i * stride - padding + k
                    if 0 <= l < L_out:
                        y[n, :, l] += x[n, ci, i] * w[ci, :, k]
    y += b[None, :, None]
    return y


if __name__ == "__main__":
    # Module config: in_channels=4, out_channels=8, kernel_size=3, stride=2
    N, C_in, C_out, L_in, K, stride = 2, 4, 8, 16, 3, 2

    key = jax.random.PRNGKey(0)
    kx, kw, kb = jax.random.split(key, 3)
    x = jax.random.normal(kx, (N, C_in, L_in), jnp.float32)
    # deterministic synthetic parameters (torch shapes: W (C_in, C_out, K), b (C_out,))
    weight = 0.1 * jax.random.normal(kw, (C_in, C_out, K), jnp.float32)
    bias = 0.1 * jax.random.normal(kb, (C_out,), jnp.float32)

    out = jax.block_until_ready(transpose_conv_block(x, weight, bias, stride))
    ref = _reference(x, weight, bias, stride)

    assert out.shape == ref.shape, (out.shape, ref.shape)
    if not np.allclose(np.asarray(out), ref, atol=1e-4, rtol=1e-4):
        raise AssertionError("Pallas transposed-conv does not match reference")
    print("KERNEL_OK")
</pallas_src>

<mosaic_0001>
module attributes {stable_mosaic.version = 11 : i64} {
  func.func @_kernel(%arg0: i32, %arg1: memref<1x4x17xf32, #tpu.memory_space<vmem>>, %arg2: memref<16x8xf32, #tpu.memory_space<vmem>>, %arg3: memref<16x1xf32, #tpu.memory_space<vmem>>, %arg4: memref<1x16x16xf32, #tpu.memory_space<vmem>>) attributes {dimension_semantics = [#tpu.dimension_semantics<parallel>], iteration_bounds = array<i64: 2>, scalar_prefetch = 0 : i64, scratch_operands = 0 : i64, tpu.core_type = #tpu.core_type<tc>, window_params = [{transform_indices = @transform_0, window_bounds = array<i64: 1, 4, 17>}, {pipeline_mode = #tpu.pipeline_mode<synchronous>, transform_indices = @transform_1, window_bounds = array<i64: 16, 8>}, {pipeline_mode = #tpu.pipeline_mode<synchronous>, transform_indices = @transform_2, window_bounds = array<i64: 16, 1>}, {transform_indices = @transform_3, window_bounds = array<i64: 1, 16, 16>}]} {
    %c0 = arith.constant 0 : index
    %c0_0 = arith.constant 0 : index
    %c0_1 = arith.constant 0 : index
    %0 = vector.load %arg1[%c0, %c0_0, %c0_1] : memref<1x4x17xf32, #tpu.memory_space<vmem>>, vector<1x4x17xf32>
    %1 = vector.shape_cast %0 : vector<1x4x17xf32> to vector<4x17xf32>
    %2 = vector.extract_strided_slice %1 {offsets = [0, 0], sizes = [4, 16], strides = [1, 1]} : vector<4x17xf32> to vector<4x16xf32>
    %3 = vector.extract_strided_slice %1 {offsets = [0, 1], sizes = [4, 16], strides = [1, 1]} : vector<4x17xf32> to vector<4x16xf32>
    %4 = tpu.concatenate %2, %3 in 0 : vector<4x16xf32>, vector<4x16xf32> -> vector<8x16xf32>
    %c0_2 = arith.constant 0 : index
    %c0_3 = arith.constant 0 : index
    %5 = vector.load %arg2[%c0_2, %c0_3] : memref<16x8xf32, #tpu.memory_space<vmem>>, vector<16x8xf32>
    %cst = arith.constant dense<0.000000e+00> : vector<16x16xf32>
    %6 = tpu.matmul %5, %4, %cst {dimension_numbers = #tpu.dot_dimension_numbers<[1], [0], [0], [1], [0, 0, 1, 1], [], []>} : vector<16x8xf32>, vector<8x16xf32>, vector<16x16xf32> -> vector<16x16xf32>
    %c0_4 = arith.constant 0 : index
    %c0_5 = arith.constant 0 : index
    %7 = vector.load %arg3[%c0_4, %c0_5] : memref<16x1xf32, #tpu.memory_space<vmem>>, vector<16x1xf32>
    %8 = vector.broadcast %7 : vector<16x1xf32> to vector<16x16xf32>
    %9 = arith.addf %6, %8 : vector<16x16xf32>
    %c0_6 = arith.constant 0 : index
    %c0_7 = arith.constant 0 : index
    %c0_8 = arith.constant 0 : index
    %10 = vector.load %arg4[%c0_6, %c0_7, %c0_8] : memref<1x16x16xf32, #tpu.memory_space<vmem>>, vector<1x16x16xf32>
    %11 = vector.shape_cast %10 : vector<1x16x16xf32> to vector<16x16xf32>
    %12 = vector.shape_cast %9 : vector<16x16xf32> to vector<1x16x16xf32>
    tpu.vector_store %arg4[%c0_6, %c0_7, %c0_8], %12 {strides = array<i32>} : memref<1x16x16xf32, #tpu.memory_space<vmem>>, vector<1x16x16xf32>,
    return
  }
  func.func @transform_0(%arg0: i32) -> (i32, i32, i32) {
    %c0_i32 = arith.constant 0 : i32
    %c0_i32_0 = arith.constant 0 : i32
    %c0_i32_1 = arith.constant 0 : i32
    return %arg0, %c0_i32, %c0_i32_0 : i32, i32, i32
  }
  func.func @transform_1(%arg0: i32) -> (i32, i32) {
    %c0_i32 = arith.constant 0 : i32
    %c0_i32_0 = arith.constant 0 : i32
    %c0_i32_1 = arith.constant 0 : i32
    return %c0_i32, %c0_i32_0 : i32, i32
  }
  func.func @transform_2(%arg0: i32) -> (i32, i32) {
    %c0_i32 = arith.constant 0 : i32
    %c0_i32_0 = arith.constant 0 : i32
    %c0_i32_1 = arith.constant 0 : i32
    return %c0_i32, %c0_i32_0 : i32, i32
  }
  func.func @transform_3(%arg0: i32) -> (i32, i32, i32) {
    %c0_i32 = arith.constant 0 : i32
    %c0_i32_0 = arith.constant 0 : i32
    %c0_i32_1 = arith.constant 0 : i32
    return %arg0, %c0_i32, %c0_i32_0 : i32, i32, i32
  }
}

</mosaic_0001>

<bundles_post_ra>
// kernel: tpu_custom_call.1
= control target key start
LH: loop header
LB: loop body
LE: loop exit
PB: predicated region body
PF: predicated region fallthrough
CT: control target
= control target key end

     0   :  { %8 = vsyncpa [#allocation3], 0  ;;  %s622_s0 = inlined_call_operand.vmem [shape: f32[2,4,17], index: 0, kind: input, shape index: {}]   ;;  %s623_s1 = inlined_call_operand.vmem [shape: f32[16,8], index: 1, kind: input, shape index: {}]   ;;  %s624_s2 = inlined_call_operand.vmem [shape: f32[16,1], index: 2, kind: input, shape index: {}]   ;;  %s625_s3 = inlined_call_operand.hbm [shape: f32[2,16,16], index: 3, kind: output, shape index: {}]  }
   0x1   :  { %10 = vsyncpa [#allocation3 + $0x1], 0  ;;  %s505_s12 = smov 0   ;;  %s507_s13 = smov 0  }
   0x2   :  { %s509_s14 = smov 0   ;;  %s511_s15 = smov 0  }
   0x3 LB: > { %s526_s16 = sadd.s32 4294967295, %s478_s15   ;;  %s349_s17 = sadd.s32 4294967294, %s478_s15   ;;  %s478_s15 = sphi %s511_s15, %s631_s15   ;;  %s474_s14 = sphi %s509_s14, %s630_s14   ;;  %s470_s13 = sphi %s507_s13, %s629_s13   ;;  %s466_s12 = sphi %s505_s12, %s628_s12  }
   0x4   : > { %s530_s18 = sadd.s32 1, %s478_s15   ;;  %s91_s19 = sadd.s32 1, %s474_s14 }
   0x5   : > { %s88_s20 = ssub.s32 %s478_s15, %s530_s18  ;;  %p101_p0 = scmp.ne.s32.totalorder %s474_s14, %s470_s13 }
   0x6   : > { %p89_p1 = scmp.eq.s32.totalorder %s88_s20, 0  ;;  %p102_p2 = scmp.eq.s32.totalorder %s526_s16, 1 }
   0x7   : > { %p107_p3 = scmp.ne.s32.totalorder %s470_s13, %s466_s12  ;;  %p108_p4 = scmp.eq.s32.totalorder %s349_s17, 1 }
   0x8   : > { %s541_s21 = scalar_select %p89_p1, %s474_s14, %s91_s19  }
   0x9   : > { %p543_p5 = por %p102_p2, %p101_p0  ;;  %p547_p6 = por %p108_p4, %p107_p3 }
   0xa   : > { %p352_p7 = scmp.ge.s32.totalorder %s478_s15, 1  ;;  %p139_p8 = scmp.lt.s32.totalorder %s478_s15, 3 }
   0xc   : > { %p140_p9 = pnand %p352_p7, %p139_p8 }
   0xd   : > { %p162_p10 = scmp.lt.s32.totalorder (!%p140_p9), %s526_s16, 1  ;;  %v174_v0 = vld [vmem:[%s623_s1] sm:$0xff] (!%p140_p9)  ;;  %vm188_vm0 = vcmask (!%p140_p9), 64512   ;;  %v177_v1 = vld [vmem:[%s624_s2 + $0x8] sm:$0xff] (!%p140_p9)  ;;  %v480_v2 = vmov (!%p140_p9), 0   ;;  %s481_s6 = smov (!%p140_p9), 127  }
   0xe   : > { %143 = sbr.rel (%p140_p9) target bundleno = 376 (0x178), region = 32  ;;  %368 = vmatprep.mubr.msk.f32.mxu0 (!%p140_p9), %vm188_vm0, %v174_v0  ;;  %415 = vset.pattern.permute.xlu1 (!%p140_p9), %v480_v2  ;;  %v176_v5 = vld [vmem:[%s624_s2] sm:$0xff] (!%p140_p9)  ;;  %vm172_vm1 = vcmask (!%p140_p9), 1043456   ;;  %v175_v8 = vld [vmem:[%s623_s1 + $0x8] sm:$0xff] (!%p140_p9)  ;;  %s159_s11 = sand.u32 (!%p140_p9), 1, %s470_s13   ;;  %vm270_vm2 = vcmask (!%p140_p9), 130048  }
   0xf   : > { %414 = vset.pattern.permute.xlu0 (!%p140_p9), %v480_v2  ;;  %185 = vperm.xlu1 (!%p140_p9), %415, %v177_v1   ;;  %s353_s17 = sshll.u32 (!%p140_p9), %s159_s11, 4  ;;  %s362_s24 = sshll.u32 (!%p140_p9), %s526_s16, 8 }
  0x10   : > { %s161_s19 = scalar_lea.vmem (!%p140_p9), [#allocation2], %s353_s17  ;;  %s579_s27 = scalar_lea.hbm (!%p140_p9), %s625_s3, %s362_s24 }
  0x11   : > { %s287_s20 = sshll.u32 (!%p140_p9), %s161_s19, 4  ;;  %s574_s20 = int_to_ptr.vmem [resolvable:$true] %s287_s20 }
  0x15   : > { %s163_s28 = scalar_select %p162_p10, %s526_s16, 1 }
  0x16   : > { %s416_s16 = scalar_lea.vmem %s574_s20, 256 }
  0x17   : > { %s354_s29 = sshll.u32 %s163_s28, 2  ;;  %s581_s28 = scalar_lea.sflag [#allocation3], %s159_s11 }
  0x18   : > { %s165_s5 = scalar_lea.vmem %s622_s0, %s354_s29  ;;  %p417_p11 = scmp.ne.s32.totalorder %s574_s20, %s416_s16 }
  0x19   : > { %v166_v3 = vld [vmem:[%s165_s5] sm:$0xf]  ;;  %s482_s29 = smov [#allocation2]  }
  0x1a   : > { %v168_v4 = vrot.slane %v166_v3, 4  ;;  %p418_p12 = pnand %p417_p11, %p543_p5  ;;  %s420_s30 = sshll.u32 %s482_s29, 4  ;;  %s421_s30 = int_to_ptr.vmem [resolvable:$false] %s420_s30 }
  0x1b   : > { %s422_s4 = scalar_lea.vmem %s421_s30, 512  ;;  %p423_p0 = scmp.lt.s32.totalorder %s574_s20, %s421_s30 }
  0x1c   : > { %169 = vrot.lane.b32.xlu0 %v168_v4, %s481_s6  ;;  %p419_p13 = pneg %p418_p12  ;;  %p424_p1 = scmp.lt.s32.totalorder %s422_s4, %s416_s16 }
  0x1e   : > { %p425_p2 = por %p424_p1, %p423_p0 }
  0x20   : > { %180 = vperm.xlu0 %414, %v176_v5   ;;  %p426_p3 = pnand %p425_p2, %p419_p13 }
  0x8e   : > { %v170_v6 = vpop.permute.xlu0 %169  ;;  %v186_v9 = vpop.permute.xlu1 %185 }
  0x8f   : > { %v173_v7 = vsel %vm172_vm1, %v166_v3, %v170_v6 }
  0x90   : > { %366 = vmatprep.subr.mxu0 %v173_v7 }
  0x91   : > { %367 = vmatpush3.msra.mxu0 %v173_v7 }
  0x92   : > { %369 = vmatmul.mubr.msk.f32.vlgmr.msra.gmra.mrb[0].mxu0 %vm188_vm0, %v175_v8 }
  0x9f   : > { %v181_v10 = vpop.permute.xlu0 %180 }
 0x165   : > { %v370_v11 = vpop.f32.mrb[0].mxu0 }
 0x166   : > { %v267_v12 = vadd.f32 %v370_v11, %v186_v9  ;;  %v261_v13 = vpop.f32.mrb[1].mxu0 }
 0x167   : > { %v262_v14 = vadd.f32 %v261_v13, %v181_v10 }
 0x168   : > { %272 = vst.msk [vmem:[%s161_s19 + $0x8] sm:$0xff] %vm270_vm2, %v267_v12 }
 0x169   : > { %271 = vst.msk [vmem:[%s161_s19] sm:$0xff] %vm270_vm2, %v262_v14 }
 0x16a   : > { %429 = shalt.err (!%p426_p3)
}
 0x16b   : > { %s430_s5 = scalar_lea.hbm %s579_s27, 256  ;;  %s434_s8 = scalar_lea.hbm %s625_s3, 512 }
 0x16c   : > { %p431_p4 = scmp.ne.s32.totalorder %s579_s27, %s430_s5  ;;  %p435_p9 = scmp.lt.u32.totalorder %s579_s27, %s625_s3 }
 0x16d   : > { %p436_p10 = scmp.lt.u32.totalorder %s434_s8, %s430_s5  ;;  %p438_p12 = scmp.lt.u32.totalorder %s430_s5, %s579_s27 }
 0x16e   : > { %p432_p7 = pnand %p431_p4, %p543_p5 }
 0x16f   : > { %p437_p11 = por %p436_p10, %p435_p9 }
 0x170   : > { %p433_p8 = pneg %p432_p7 }
 0x171   : > { %p439_p13 = por %p438_p12, %p437_p11 }
 0x173   : > { %p440_p0 = pnand %p439_p13, %p433_p8 }
 0x175   : > { %443 = shalt.err (!%p440_p0)
}
 0x176   : > { %s483_s11 = smov 128   ;;  %s484_s17 = smov 8  }
 0x177   : > { %371 = dma.vmem_to_hbm [thread:$0]  (%p543_p5), %s574_s20, 256, %s579_s27, %s581_s28, %s483_s11, %s483_s11, %s484_s17  }
 0x178 PF: > { %p377_p1 = scmp.ge.s32.totalorder %s478_s15, 2  ;;  %s302_s19 = sand.u32 1, %s466_s12  }
 0x179   : > { %s303_s24 = scalar_lea.sflag [#allocation3], %s302_s19 }
 0x17a   : > { %p374_p2 = pnand %p377_p1, %p547_p6 }
 0x17c   : > { %461 = dma.done.wait (!%p374_p2), %s303_s24, 256  }
 0x17d   : > { %463 = vsyncadd (!%p374_p2), %s303_s24, 4294967040  ;;  %p13_p3 = scmp.ge.s32.totalorder %s530_s18, 4   ;;  %s628_s12 = smov %s470_s13 }
 0x17e   : > { %s629_s13 = smov %s474_s14  ;;  %s630_s14 = smov %s541_s21 }
 0x17f   : > { %s631_s15 = smov %s530_s18  ;;  %15 = sbr.rel (!%p13_p3) target bundleno = 3 (0x3), region = 67 }
 0x186   :  { %308 = vsyncpa [#allocation3], 1 }
 0x187   :  { %310 = vsyncpa [#allocation3 + $0x1], 1 }

</bundles_post_ra>
